<compile_context>
chip_gen: v7x
topology: tpu7x:2x2x1
jax: 0.10.0
libtpu: 0.0.40
codegen_flags: <defaults>
</compile_context>

<pallas_src>
import jax
import jax.numpy as jnp
from jax.experimental import pallas as pl
from jax.experimental.pallas import tpu as pltpu


# ---------------------------------------------------------------------------
# Shared in-kernel epilogue: softmax over views + weighted sum over views.
# ---------------------------------------------------------------------------
def _softmax_weighted_sum(x_ref, o_ref, tanh_scores):
    """tanh_scores: list of V arrays of shape (R, 1), f32 (already tanh'ed)."""
    n_views = len(tanh_scores)
    t_max = tanh_scores[0]
    for v in range(1, n_views):
        t_max = jnp.maximum(t_max, tanh_scores[v])
    exps = [jnp.exp(t - t_max) for t in tanh_scores]
    denom = exps[0]
    for v in range(1, n_views):
        denom = denom + exps[v]
    inv = 1.0 / denom                     # exact divide; kernel is mem-bound
    # Just-in-time cast of each view slice: one (R, C) f32 temp at a time.
    acc = (exps[0] * inv) * x_ref[0].astype(jnp.float32)
    for v in range(1, n_views):
        acc = acc + (exps[v] * inv) * x_ref[v].astype(jnp.float32)
    o_ref[...] = acc.astype(o_ref.dtype)


# ---------------------------------------------------------------------------
# Fused single-HBM-pass kernel: one batch element per grid step.
# ---------------------------------------------------------------------------
def _fused_kernel(x_ref, w_ref, b_ref, o_ref):
    # x_ref: (V, M, C) native dtype   w_ref: (V, C, C)   b_ref: (V, C)
    # o_ref: (M, C)
    n_views = x_ref.shape[0]
    b = b_ref[...].astype(jnp.float32)                              # (V, C)
    scores = []
    for v in range(n_views):
        xv = x_ref[v].astype(jnp.float32)                           # (M, C)
        s_v = jnp.mean(xv, axis=0, keepdims=True)                   # (1, C)
        w_v = w_ref[v].astype(jnp.float32)                          # (C, C) [out, in]
        # u[i] = sum_o s[o] * W[o, i]  (tiny MXU matvec)
        u_v = jnp.dot(s_v, w_v, preferred_element_type=jnp.float32)  # (1, C)
        c0_v = jnp.sum(s_v * b[v:v + 1, :], axis=-1, keepdims=True)  # (1, 1)
        score_v = jnp.sum(xv * u_v, axis=-1, keepdims=True) + c0_v   # (M, 1)
        scores.append(jnp.tanh(score_v))
    _softmax_weighted_sum(x_ref, o_ref, scores)


# ---------------------------------------------------------------------------
# Two-pass fallback kernel: (batch, row-tile) per grid step, u/c0 precomputed.
# ---------------------------------------------------------------------------
def _twopass_kernel(x_ref, u_ref, c0_ref, o_ref):
    # x_ref: (V, R, C) native dtype   u_ref: (V, C) f32   c0_ref: (V, 1) f32
    # o_ref: (R, C)
    n_views = x_ref.shape[0]
    u = u_ref[...]
    c0 = c0_ref[...]
    scores = []
    for v in range(n_views):
        xv = x_ref[v].astype(jnp.float32)                            # (R, C)
        score_v = (jnp.sum(xv * u[v:v + 1, :], axis=-1, keepdims=True)
                   + c0[v:v + 1, :])                                  # (R, 1)
        scores.append(jnp.tanh(score_v))
    _softmax_weighted_sum(x_ref, o_ref, scores)


# ---------------------------------------------------------------------------
# Wrapper: generation-aware budgets, path selection, tiling.
# ---------------------------------------------------------------------------
def _vmem_capacity_bytes():
    try:
        cap = int(pltpu.get_tpu_info().vmem_capacity_bytes)
        if cap >= (16 << 20):
            return cap
    except Exception:
        pass
    return 64 << 20        # conservative default: assume v7x-sized VMEM


def _choose_row_tile(M, V, C, granule, target_bytes):
    """Rows per grid step for the two-pass path (f32-equivalent working set)."""
    per_row = max(1, V * C * 4)
    tm = target_bytes // per_row
    tm = int(min(M, max(granule, tm)))
    tm -= tm % granule
    if tm <= 0 or tm >= M:
        return M
    return tm


def multiplex_attention(x, w, b, *, mode="auto", row_tile=None):
    assert mode in ("auto", "fused", "twopass"), mode
    V, N, M, C = x.shape
    assert w.shape == (V, C, C), w.shape   # out_channels must equal in_channels
    assert b.shape == (V, C), b.shape

    x_is = jnp.dtype(x.dtype).itemsize
    w_is = jnp.dtype(w.dtype).itemsize
    granule = 8 * max(1, 4 // x_is)            # 8 for f32, 16 for bf16, 32 for i8

    cap = _vmem_capacity_bytes()
    vmem_cap = int(min(cap * 3 // 4, 100 << 20))      # ~48 MiB v7x / ~96 MiB v5e,v6e
    fused_budget = cap // 4                           # ~16 MiB v7x / ~32 MiB v5e,v6e
    tile_target = int(min(8 << 20, max(4 << 20, cap // 16)))

    # Per-grid-step footprint estimate for the fused variant.
    fused_est = (2 * V * M * C * x_is            # x slab, double-buffered
                 + 2 * M * C * x_is              # out slab, double-buffered
                 + 4 * M * C * 4                 # f32 intermediates (xv cast, acc, ...)
                 + 2 * V * C * C * w_is          # resident weights (buffered)
                 + C * C * 4 + 4 * V * C * 4)

    if mode == "auto":
        tm_probe = _choose_row_tile(M, V, C, granule, tile_target)
        two_pass_steps = N * pl.cdiv(M, tm_probe)
        # Fuse (single HBM read of x) when the per-batch slab fits.  Exception:
        # N == 1 would give the fused grid a single step and idle the second
        # TensorCore on v7x; prefer the M-tiled two-pass path there.
        use_fused = (fused_est <= fused_budget) and (N >= 2 or two_pass_steps < 2)
    else:
        use_fused = (mode == "fused")

    if use_fused:
        vmem_limit = int(min(vmem_cap, max(8 << 20, fused_est + (4 << 20))))
        return pl.pallas_call(
            _fused_kernel,
            out_shape=jax.ShapeDtypeStruct((N, M, C), x.dtype),
            grid=(N,),
            in_specs=[
                # x: batch dim squeezed; kernel sees (V, M, C)
                pl.BlockSpec((V, None, M, C), lambda n: (0, n, 0, 0)),
                # W, b: whole arrays, constant block index -> fetched once
                pl.BlockSpec((V, C, C), lambda n: (0, 0, 0)),
                pl.BlockSpec((V, C), lambda n: (0, 0)),
            ],
            out_specs=pl.BlockSpec((None, M, C), lambda n: (n, 0, 0)),
            compiler_params=pltpu.CompilerParams(
                dimension_semantics=("parallel",),
                vmem_limit_bytes=vmem_limit),
        )(x, w, b)

    # -------- two-pass fallback: tiny XLA precompute, rows tiled ------------
    s = jnp.mean(x.astype(jnp.float32), axis=2)                       # (V, N, C)
    u = jnp.einsum("vno,voc->vnc", s, w.astype(jnp.float32),
                   preferred_element_type=jnp.float32)                # (V, N, C)
    c0 = jnp.einsum("vnc,vc->vn", s, b.astype(jnp.float32),
                    preferred_element_type=jnp.float32)               # (V, N)
    u_t = jnp.transpose(u, (1, 0, 2))                                 # (N, V, C)
    c0_t = jnp.transpose(c0, (1, 0))[:, :, None]                      # (N, V, 1)

    tm = row_tile if row_tile is not None else _choose_row_tile(
        M, V, C, granule, tile_target)
    assert tm == M or (0 < tm <= M and tm % 8 == 0), (M, tm)
    n_mt = int(pl.cdiv(M, tm))        # ragged last tile OK (rows independent,
    grid = (N * n_mt,)                # padded rows are never stored)

    step_est = (2 * V * tm * C * x_is + 2 * tm * C * x_is
                + 4 * tm * C * 4 + 8 * V * C * 4)
    vmem_limit = int(min(vmem_cap, max(8 << 20, step_est + (4 << 20))))

    return pl.pallas_call(
        _twopass_kernel,
        out_shape=jax.ShapeDtypeStruct((N, M, C), x.dtype),
        grid=grid,
        in_specs=[
            # x: batch dim squeezed; kernel sees (V, tm, C); m-tile fastest
            pl.BlockSpec((V, None, tm, C), lambda r: (0, r // n_mt, r % n_mt, 0)),
            # u: kernel sees (V, C) for the current batch element
            pl.BlockSpec((None, V, C), lambda r: (r // n_mt, 0, 0)),
            # c0: kernel sees (V, 1)
            pl.BlockSpec((None, V, 1), lambda r: (r // n_mt, 0, 0)),
        ],
        out_specs=pl.BlockSpec((None, tm, C), lambda r: (r // n_mt, r % n_mt, 0)),
        compiler_params=pltpu.CompilerParams(
            dimension_semantics=("parallel",),
            vmem_limit_bytes=vmem_limit),
    )(x, u_t, c0_t)


# ---------------------------------------------------------------------------
# Pure-JAX reference mirroring the PyTorch forward exactly.
# ---------------------------------------------------------------------------
def multiplex_attention_ref(x, w, b):
    y = jnp.einsum("vnmc,voc->vnmo", x, w) + b[:, None, None, :]
    s = jnp.mean(x, axis=2)                               # (V, N, C)
    score = jnp.einsum("vnc,vnmc->vnm", s, y)             # (V, N, M)
    a = jax.nn.softmax(jnp.tanh(score), axis=0)           # softmax over views
    return jnp.einsum("vnm,vnmc->nmc", a, x)              # (N, M, C)


def _make_inputs(key, V, N, M, C):
    kx, kw, kb = jax.random.split(key, 3)
    x = jax.random.normal(kx, (V, N, M, C), dtype=jnp.float32)
    bound = 1.0 / (C ** 0.5)   # PyTorch Linear default init range
    w = jax.random.uniform(kw, (V, C, C), minval=-bound, maxval=bound,
                           dtype=jnp.float32)
    b = jax.random.uniform(kb, (V, C), minval=-bound, maxval=bound,
                           dtype=jnp.float32)
    return x, w, b


if __name__ == "__main__":
    keys = jax.random.split(jax.random.PRNGKey(0), 3)
    TOL = dict(atol=1e-4, rtol=1e-4)

    # Case 1: module's toy shape (n_views=4, batch=2, seq=8, channels=32);
    # auto mode -> fused single-HBM-pass path.
    x, w, b = _make_inputs(keys[0], 4, 2, 8, 32)
    out = jax.block_until_ready(multiplex_attention(x, w, b))
    ref = multiplex_attention_ref(x, w, b)
    assert out.shape == ref.shape, (out.shape, ref.shape)
    assert jnp.allclose(out, ref, **TOL), float(jnp.max(jnp.abs(out - ref)))

    # Case 2: forced two-pass path with several row tiles per batch, including
    # a ragged last tile (M=72, tm=16 -> 5 tiles, last one partial).
    x2, w2, b2 = _make_inputs(keys[1], 4, 2, 72, 32)
    out2 = jax.block_until_ready(
        multiplex_attention(x2, w2, b2, mode="twopass", row_tile=16))
    ref2 = multiplex_attention_ref(x2, w2, b2)
    assert jnp.allclose(out2, ref2, **TOL), float(jnp.max(jnp.abs(out2 - ref2)))

    # Case 3: forced fused path with batch of 1 (single-step grid).
    x3, w3, b3 = _make_inputs(keys[2], 3, 1, 16, 32)
    out3 = jax.block_until_ready(multiplex_attention(x3, w3, b3, mode="fused"))
    ref3 = multiplex_attention_ref(x3, w3, b3)
    assert jnp.allclose(out3, ref3, **TOL), float(jnp.max(jnp.abs(out3 - ref3)))

    print("KERNEL_OK")
</pallas_src>

<mosaic_0001>
module attributes {stable_mosaic.version = 11 : i64} {
  func.func @_fused_kernel(%arg0: i32, %arg1: memref<4x1x8x32xf32, #tpu.memory_space<vmem>>, %arg2: memref<4x32x32xf32, #tpu.memory_space<vmem>>, %arg3: memref<4x32xf32, #tpu.memory_space<vmem>>, %arg4: memref<1x8x32xf32, #tpu.memory_space<vmem>>) attributes {dimension_semantics = [#tpu.dimension_semantics<parallel>], iteration_bounds = array<i64: 2>, scalar_prefetch = 0 : i64, scratch_operands = 0 : i64, tpu.core_type = #tpu.core_type<tc>, window_params = [{transform_indices = @transform_0, window_bounds = array<i64: 4, 1, 8, 32>}, {pipeline_mode = #tpu.pipeline_mode<synchronous>, transform_indices = @transform_1, window_bounds = array<i64: 4, 32, 32>}, {pipeline_mode = #tpu.pipeline_mode<synchronous>, transform_indices = @transform_2, window_bounds = array<i64: 4, 32>}, {transform_indices = @transform_3, window_bounds = array<i64: 1, 8, 32>}]} {
    %c0 = arith.constant 0 : index
    %c0_0 = arith.constant 0 : index
    %0 = vector.load %arg3[%c0, %c0_0] : memref<4x32xf32, #tpu.memory_space<vmem>>, vector<4x32xf32>
    %c0_1 = arith.constant 0 : index
    %c0_2 = arith.constant 0 : index
    %c0_3 = arith.constant 0 : index
    %c0_4 = arith.constant 0 : index
    %1 = vector.load %arg1[%c0_1, %c0_2, %c0_3, %c0_4] : memref<4x1x8x32xf32, #tpu.memory_space<vmem>>, vector<1x1x8x32xf32>
    %2 = vector.shape_cast %1 : vector<1x1x8x32xf32> to vector<8x32xf32>
    %cst = arith.constant dense<0.000000e+00> : vector<32xf32>
    %3 = vector.multi_reduction <add>, %2, %cst [0] : vector<8x32xf32> to vector<32xf32>
    %4 = vector.shape_cast %3 : vector<32xf32> to vector<1x32xf32>
    %cst_5 = arith.constant 8.000000e+00 : f32
    %5 = vector.broadcast %cst_5 : f32 to vector<1x32xf32>
    %6 = arith.divf %4, %5 : vector<1x32xf32>
    %c0_6 = arith.constant 0 : index
    %c0_7 = arith.constant 0 : index
    %c0_8 = arith.constant 0 : index
    %7 = vector.load %arg2[%c0_6, %c0_7, %c0_8] : memref<4x32x32xf32, #tpu.memory_space<vmem>>, vector<1x32x32xf32>
    %8 = vector.shape_cast %7 : vector<1x32x32xf32> to vector<32x32xf32>
    %cst_9 = arith.constant dense<0.000000e+00> : vector<1x32xf32>
    %9 = tpu.matmul %6, %8, %cst_9 {dimension_numbers = #tpu.dot_dimension_numbers<[1], [0], [0], [1], [0, 0, 1, 1], [], []>} : vector<1x32xf32>, vector<32x32xf32>, vector<1x32xf32> -> vector<1x32xf32>
    %10 = vector.extract_strided_slice %0 {offsets = [0, 0], sizes = [1, 32], strides = [1, 1]} : vector<4x32xf32> to vector<1x32xf32>
    %11 = arith.mulf %6, %10 : vector<1x32xf32>
    %cst_10 = arith.constant dense<0.000000e+00> : vector<1xf32>
    %12 = vector.multi_reduction <add>, %11, %cst_10 [1] : vector<1x32xf32> to vector<1xf32>
    %13 = vector.shape_cast %12 : vector<1xf32> to vector<1x1xf32>
    %14 = vector.broadcast %9 : vector<1x32xf32> to vector<8x32xf32>
    %15 = arith.mulf %2, %14 : vector<8x32xf32>
    %cst_11 = arith.constant dense<0.000000e+00> : vector<8xf32>
    %16 = vector.multi_reduction <add>, %15, %cst_11 [1] : vector<8x32xf32> to vector<8xf32>
    %17 = vector.shape_cast %16 : vector<8xf32> to vector<8x1xf32>
    %18 = vector.broadcast %13 : vector<1x1xf32> to vector<8x1xf32>
    %19 = arith.addf %17, %18 : vector<8x1xf32>
    %20 = math.tanh %19 : vector<8x1xf32>
    %c1 = arith.constant 1 : index
    %c0_12 = arith.constant 0 : index
    %c0_13 = arith.constant 0 : index
    %c0_14 = arith.constant 0 : index
    %21 = vector.load %arg1[%c1, %c0_12, %c0_13, %c0_14] : memref<4x1x8x32xf32, #tpu.memory_space<vmem>>, vector<1x1x8x32xf32>
    %22 = vector.shape_cast %21 : vector<1x1x8x32xf32> to vector<8x32xf32>
    %cst_15 = arith.constant dense<0.000000e+00> : vector<32xf32>
    %23 = vector.multi_reduction <add>, %22, %cst_15 [0] : vector<8x32xf32> to vector<32xf32>
    %24 = vector.shape_cast %23 : vector<32xf32> to vector<1x32xf32>
    %cst_16 = arith.constant 8.000000e+00 : f32
    %25 = vector.broadcast %cst_16 : f32 to vector<1x32xf32>
    %26 = arith.divf %24, %25 : vector<1x32xf32>
    %c1_17 = arith.constant 1 : index
    %c0_18 = arith.constant 0 : index
    %c0_19 = arith.constant 0 : index
    %27 = vector.load %arg2[%c1_17, %c0_18, %c0_19] : memref<4x32x32xf32, #tpu.memory_space<vmem>>, vector<1x32x32xf32>
    %28 = vector.shape_cast %27 : vector<1x32x32xf32> to vector<32x32xf32>
    %cst_20 = arith.constant dense<0.000000e+00> : vector<1x32xf32>
    %29 = tpu.matmul %26, %28, %cst_20 {dimension_numbers = #tpu.dot_dimension_numbers<[1], [0], [0], [1], [0, 0, 1, 1], [], []>} : vector<1x32xf32>, vector<32x32xf32>, vector<1x32xf32> -> vector<1x32xf32>
    %30 = vector.extract_strided_slice %0 {offsets = [1, 0], sizes = [1, 32], strides = [1, 1]} : vector<4x32xf32> to vector<1x32xf32>
    %31 = arith.mulf %26, %30 : vector<1x32xf32>
    %cst_21 = arith.constant dense<0.000000e+00> : vector<1xf32>
    %32 = vector.multi_reduction <add>, %31, %cst_21 [1] : vector<1x32xf32> to vector<1xf32>
    %33 = vector.shape_cast %32 : vector<1xf32> to vector<1x1xf32>
    %34 = vector.broadcast %29 : vector<1x32xf32> to vector<8x32xf32>
    %35 = arith.mulf %22, %34 : vector<8x32xf32>
    %cst_22 = arith.constant dense<0.000000e+00> : vector<8xf32>
    %36 = vector.multi_reduction <add>, %35, %cst_22 [1] : vector<8x32xf32> to vector<8xf32>
    %37 = vector.shape_cast %36 : vector<8xf32> to vector<8x1xf32>
    %38 = vector.broadcast %33 : vector<1x1xf32> to vector<8x1xf32>
    %39 = arith.addf %37, %38 : vector<8x1xf32>
    %40 = math.tanh %39 : vector<8x1xf32>
    %c2 = arith.constant 2 : index
    %c0_23 = arith.constant 0 : index
    %c0_24 = arith.constant 0 : index
    %c0_25 = arith.constant 0 : index
    %41 = vector.load %arg1[%c2, %c0_23, %c0_24, %c0_25] : memref<4x1x8x32xf32, #tpu.memory_space<vmem>>, vector<1x1x8x32xf32>
    %42 = vector.shape_cast %41 : vector<1x1x8x32xf32> to vector<8x32xf32>
    %cst_26 = arith.constant dense<0.000000e+00> : vector<32xf32>
    %43 = vector.multi_reduction <add>, %42, %cst_26 [0] : vector<8x32xf32> to vector<32xf32>
    %44 = vector.shape_cast %43 : vector<32xf32> to vector<1x32xf32>
    %cst_27 = arith.constant 8.000000e+00 : f32
    %45 = vector.broadcast %cst_27 : f32 to vector<1x32xf32>
    %46 = arith.divf %44, %45 : vector<1x32xf32>
    %c2_28 = arith.constant 2 : index
    %c0_29 = arith.constant 0 : index
    %c0_30 = arith.constant 0 : index
    %47 = vector.load %arg2[%c2_28, %c0_29, %c0_30] : memref<4x32x32xf32, #tpu.memory_space<vmem>>, vector<1x32x32xf32>
    %48 = vector.shape_cast %47 : vector<1x32x32xf32> to vector<32x32xf32>
    %cst_31 = arith.constant dense<0.000000e+00> : vector<1x32xf32>
    %49 = tpu.matmul %46, %48, %cst_31 {dimension_numbers = #tpu.dot_dimension_numbers<[1], [0], [0], [1], [0, 0, 1, 1], [], []>} : vector<1x32xf32>, vector<32x32xf32>, vector<1x32xf32> -> vector<1x32xf32>
    %50 = vector.extract_strided_slice %0 {offsets = [2, 0], sizes = [1, 32], strides = [1, 1]} : vector<4x32xf32> to vector<1x32xf32>
    %51 = arith.mulf %46, %50 : vector<1x32xf32>
    %cst_32 = arith.constant dense<0.000000e+00> : vector<1xf32>
    %52 = vector.multi_reduction <add>, %51, %cst_32 [1] : vector<1x32xf32> to vector<1xf32>
    %53 = vector.shape_cast %52 : vector<1xf32> to vector<1x1xf32>
    %54 = vector.broadcast %49 : vector<1x32xf32> to vector<8x32xf32>
    %55 = arith.mulf %42, %54 : vector<8x32xf32>
    %cst_33 = arith.constant dense<0.000000e+00> : vector<8xf32>
    %56 = vector.multi_reduction <add>, %55, %cst_33 [1] : vector<8x32xf32> to vector<8xf32>
    %57 = vector.shape_cast %56 : vector<8xf32> to vector<8x1xf32>
    %58 = vector.broadcast %53 : vector<1x1xf32> to vector<8x1xf32>
    %59 = arith.addf %57, %58 : vector<8x1xf32>
    %60 = math.tanh %59 : vector<8x1xf32>
    %c3 = arith.constant 3 : index
    %c0_34 = arith.constant 0 : index
    %c0_35 = arith.constant 0 : index
    %c0_36 = arith.constant 0 : index
    %61 = vector.load %arg1[%c3, %c0_34, %c0_35, %c0_36] : memref<4x1x8x32xf32, #tpu.memory_space<vmem>>, vector<1x1x8x32xf32>
    %62 = vector.shape_cast %61 : vector<1x1x8x32xf32> to vector<8x32xf32>
    %cst_37 = arith.constant dense<0.000000e+00> : vector<32xf32>
    %63 = vector.multi_reduction <add>, %62, %cst_37 [0] : vector<8x32xf32> to vector<32xf32>
    %64 = vector.shape_cast %63 : vector<32xf32> to vector<1x32xf32>
    %cst_38 = arith.constant 8.000000e+00 : f32
    %65 = vector.broadcast %cst_38 : f32 to vector<1x32xf32>
    %66 = arith.divf %64, %65 : vector<1x32xf32>
    %c3_39 = arith.constant 3 : index
    %c0_40 = arith.constant 0 : index
    %c0_41 = arith.constant 0 : index
    %67 = vector.load %arg2[%c3_39, %c0_40, %c0_41] : memref<4x32x32xf32, #tpu.memory_space<vmem>>, vector<1x32x32xf32>
    %68 = vector.shape_cast %67 : vector<1x32x32xf32> to vector<32x32xf32>
    %cst_42 = arith.constant dense<0.000000e+00> : vector<1x32xf32>
    %69 = tpu.matmul %66, %68, %cst_42 {dimension_numbers = #tpu.dot_dimension_numbers<[1], [0], [0], [1], [0, 0, 1, 1], [], []>} : vector<1x32xf32>, vector<32x32xf32>, vector<1x32xf32> -> vector<1x32xf32>
    %70 = vector.extract_strided_slice %0 {offsets = [3, 0], sizes = [1, 32], strides = [1, 1]} : vector<4x32xf32> to vector<1x32xf32>
    %71 = arith.mulf %66, %70 : vector<1x32xf32>
    %cst_43 = arith.constant dense<0.000000e+00> : vector<1xf32>
    %72 = vector.multi_reduction <add>, %71, %cst_43 [1] : vector<1x32xf32> to vector<1xf32>
    %73 = vector.shape_cast %72 : vector<1xf32> to vector<1x1xf32>
    %74 = vector.broadcast %69 : vector<1x32xf32> to vector<8x32xf32>
    %75 = arith.mulf %62, %74 : vector<8x32xf32>
    %cst_44 = arith.constant dense<0.000000e+00> : vector<8xf32>
    %76 = vector.multi_reduction <add>, %75, %cst_44 [1] : vector<8x32xf32> to vector<8xf32>
    %77 = vector.shape_cast %76 : vector<8xf32> to vector<8x1xf32>
    %78 = vector.broadcast %73 : vector<1x1xf32> to vector<8x1xf32>
    %79 = arith.addf %77, %78 : vector<8x1xf32>
    %80 = math.tanh %79 : vector<8x1xf32>
    %81 = arith.maximumf %20, %40 : vector<8x1xf32>
    %82 = arith.maximumf %81, %60 : vector<8x1xf32>
    %83 = arith.maximumf %82, %80 : vector<8x1xf32>
    %84 = arith.subf %20, %83 : vector<8x1xf32>
    %85 = math.exp %84 : vector<8x1xf32>
    %86 = arith.subf %40, %83 : vector<8x1xf32>
    %87 = math.exp %86 : vector<8x1xf32>
    %88 = arith.subf %60, %83 : vector<8x1xf32>
    %89 = math.exp %88 : vector<8x1xf32>
    %90 = arith.subf %80, %83 : vector<8x1xf32>
    %91 = math.exp %90 : vector<8x1xf32>
    %92 = arith.addf %85, %87 : vector<8x1xf32>
    %93 = arith.addf %92, %89 : vector<8x1xf32>
    %94 = arith.addf %93, %91 : vector<8x1xf32>
    %cst_45 = arith.constant 1.000000e+00 : f32
    %95 = vector.broadcast %cst_45 : f32 to vector<8x1xf32>
    %96 = arith.divf %95, %94 : vector<8x1xf32>
    %97 = arith.mulf %85, %96 : vector<8x1xf32>
    %c0_46 = arith.constant 0 : index
    %c0_47 = arith.constant 0 : index
    %c0_48 = arith.constant 0 : index
    %c0_49 = arith.constant 0 : index
    %98 = vector.load %arg1[%c0_46, %c0_47, %c0_48, %c0_49] : memref<4x1x8x32xf32, #tpu.memory_space<vmem>>, vector<1x1x8x32xf32>
    %99 = vector.shape_cast %98 : vector<1x1x8x32xf32> to vector<8x32xf32>
    %100 = vector.broadcast %97 : vector<8x1xf32> to vector<8x32xf32>
    %101 = arith.mulf %100, %99 : vector<8x32xf32>
    %102 = arith.mulf %87, %96 : vector<8x1xf32>
    %c1_50 = arith.constant 1 : index
    %c0_51 = arith.constant 0 : index
    %c0_52 = arith.constant 0 : index
    %c0_53 = arith.constant 0 : index
    %103 = vector.load %arg1[%c1_50, %c0_51, %c0_52, %c0_53] : memref<4x1x8x32xf32, #tpu.memory_space<vmem>>, vector<1x1x8x32xf32>
    %104 = vector.shape_cast %103 : vector<1x1x8x32xf32> to vector<8x32xf32>
    %105 = vector.broadcast %102 : vector<8x1xf32> to vector<8x32xf32>
    %106 = arith.mulf %105, %104 : vector<8x32xf32>
    %107 = arith.addf %101, %106 : vector<8x32xf32>
    %108 = arith.mulf %89, %96 : vector<8x1xf32>
    %c2_54 = arith.constant 2 : index
    %c0_55 = arith.constant 0 : index
    %c0_56 = arith.constant 0 : index
    %c0_57 = arith.constant 0 : index
    %109 = vector.load %arg1[%c2_54, %c0_55, %c0_56, %c0_57] : memref<4x1x8x32xf32, #tpu.memory_space<vmem>>, vector<1x1x8x32xf32>
    %110 = vector.shape_cast %109 : vector<1x1x8x32xf32> to vector<8x32xf32>
    %111 = vector.broadcast %108 : vector<8x1xf32> to vector<8x32xf32>
    %112 = arith.mulf %111, %110 : vector<8x32xf32>
    %113 = arith.addf %107, %112 : vector<8x32xf32>
    %114 = arith.mulf %91, %96 : vector<8x1xf32>
    %c3_58 = arith.constant 3 : index
    %c0_59 = arith.constant 0 : index
    %c0_60 = arith.constant 0 : index
    %c0_61 = arith.constant 0 : index
    %115 = vector.load %arg1[%c3_58, %c0_59, %c0_60, %c0_61] : memref<4x1x8x32xf32, #tpu.memory_space<vmem>>, vector<1x1x8x32xf32>
    %116 = vector.shape_cast %115 : vector<1x1x8x32xf32> to vector<8x32xf32>
    %117 = vector.broadcast %114 : vector<8x1xf32> to vector<8x32xf32>
    %118 = arith.mulf %117, %116 : vector<8x32xf32>
    %119 = arith.addf %113, %118 : vector<8x32xf32>
    %c0_62 = arith.constant 0 : index
    %c0_63 = arith.constant 0 : index
    %c0_64 = arith.constant 0 : index
    %120 = vector.load %arg4[%c0_62, %c0_63, %c0_64] : memref<1x8x32xf32, #tpu.memory_space<vmem>>, vector<1x8x32xf32>
    %121 = vector.shape_cast %120 : vector<1x8x32xf32> to vector<8x32xf32>
    %122 = vector.shape_cast %119 : vector<8x32xf32> to vector<1x8x32xf32>
    tpu.vector_store %arg4[%c0_62, %c0_63, %c0_64], %122 {strides = array<i32>} : memref<1x8x32xf32, #tpu.memory_space<vmem>>, vector<1x8x32xf32>,
    return
  }
  func.func @transform_0(%arg0: i32) -> (i32, i32, i32, i32) {
    %c0_i32 = arith.constant 0 : i32
    %c0_i32_0 = arith.constant 0 : i32
    %c0_i32_1 = arith.constant 0 : i32
    %c0_i32_2 = arith.constant 0 : i32
    return %c0_i32, %arg0, %c0_i32_0, %c0_i32_1 : i32, i32, i32, i32
  }
  func.func @transform_1(%arg0: i32) -> (i32, i32, i32) {
    %c0_i32 = arith.constant 0 : i32
    %c0_i32_0 = arith.constant 0 : i32
    %c0_i32_1 = arith.constant 0 : i32
    %c0_i32_2 = arith.constant 0 : i32
    return %c0_i32, %c0_i32_0, %c0_i32_1 : i32, i32, i32
  }
  func.func @transform_2(%arg0: i32) -> (i32, i32) {
    %c0_i32 = arith.constant 0 : i32
    %c0_i32_0 = arith.constant 0 : i32
    %c0_i32_1 = arith.constant 0 : i32
    return %c0_i32, %c0_i32_0 : i32, i32
  }
  func.func @transform_3(%arg0: i32) -> (i32, i32, i32) {
    %c0_i32 = arith.constant 0 : i32
    %c0_i32_0 = arith.constant 0 : i32
    %c0_i32_1 = arith.constant 0 : i32
    return %arg0, %c0_i32, %c0_i32_0 : i32, i32, i32
  }
}

</mosaic_0001>

<bundles_post_ra>
// kernel: tpu_custom_call.1
= control target key start
LH: loop header
LB: loop body
LE: loop exit
PB: predicated region body
PF: predicated region fallthrough
CT: control target
= control target key end

     0   :  { %8 = vsyncpa [#allocation3], 0  ;;  %s1369_s0 = inlined_call_operand.hbm [shape: f32[4,2,8,32], index: 0, kind: input, shape index: {}]   ;;  %s1370_s1 = inlined_call_operand.hbm [shape: f32[4,32,32], index: 1, kind: input, shape index: {}]   ;;  %s1371_s2 = inlined_call_operand.vmem [shape: f32[4,32], index: 2, kind: input, shape index: {}]   ;;  %s1372_s3 = inlined_call_operand.hbm [shape: f32[2,8,32], index: 3, kind: output, shape index: {}]  }
   0x1   :  { %10 = vsyncpa [#allocation3 + $0x1], 0 }
   0x2   :  { %11 = vsyncpa [#allocation6], 0 }
   0x3   :  { %12 = vsyncpa [#allocation4], 0 }
   0x4   :  { %14 = vsyncpa [#allocation4 + $0x1], 0  ;;  %s1107_s12 = smov 0   ;;  %s1109_s13 = smov 0  }
   0x5   :  { %s1111_s14 = smov 0   ;;  %s1113_s15 = smov 0  }
   0x6 LB: > { %s1128_s16 = sadd.s32 4294967295, %s1076_s15   ;;  %s758_s17 = sadd.s32 4294967294, %s1076_s15   ;;  %s1076_s15 = sphi %s1113_s15, %s1396_s15   ;;  %s1072_s14 = sphi %s1111_s14, %s1395_s14   ;;  %s1068_s13 = sphi %s1109_s13, %s1394_s13   ;;  %s1064_s12 = sphi %s1107_s12, %s1393_s12  }
   0x7   : > { %s1132_s18 = sadd.s32 1, %s1076_s15   ;;  %s27_s19 = sadd.s32 1, %s1072_s14 }
   0x8   : > { %s24_s20 = ssub.s32 %s1076_s15, %s1132_s18  ;;  %p34_p0 = scmp.ne.s32.totalorder %s1072_s14, %s1068_s13 }
   0x9   : > { %p25_p1 = scmp.eq.s32.totalorder %s24_s20, 0  ;;  %p35_p2 = scmp.eq.s32.totalorder %s1076_s15, 0 }
   0xa   : > { %p40_p3 = scmp.ne.s32.totalorder %s1068_s13, %s1064_s12  ;;  %p1373_p4 = scmp.eq.s32.totalorder %s1128_s16, 0 }
   0xb   : > { %s1144_s21 = scalar_select %p25_p1, %s1072_s14, %s27_s19  }
   0xc   : > { %p1146_p5 = por %p35_p2, %p34_p0  ;;  %p1152_p6 = por %p1373_p4, %p40_p3 }
   0xd   : > { %p106_p7 = scmp.eq.s32.totalorder %s1128_s16, 1  ;;  %p112_p8 = scmp.eq.s32.totalorder %s758_s17, 1 }
   0xe   : > { %s1377_s22 = scalar_select %p1146_p5, 1, 0 }
   0xf   : > { %s1378_s23 = scalar_select %p1152_p6, 1, 0 }
  0x10   : > { %p759_p9 = scmp.ge.s32.totalorder %s1076_s15, 1  ;;  %p119_p10 = scmp.lt.s32.totalorder %s1076_s15, 3 }
  0x11   : > { %p1159_p11 = por %p106_p7, %p34_p0  ;;  %p1163_p12 = por %p112_p8, %p40_p3 }
  0x12   : > { %p1167_p13 = pnand %p759_p9, %p119_p10  ;;  %s1078_s27 = smov [#allocation5]  }
  0x13   : > { %s1379_s24 = scalar_select %p1159_p11, 1, 0 }
  0x14   : > { %s1380_s25 = scalar_select %p1163_p12, 1, 0 }
  0x15   : > { %s1381_s26 = scalar_select %p1167_p13, 1, 0 }
  0x16   : > { %p875_p1 = pneg %p1167_p13  ;;  %s131_s28 = sshll.u32 %s1078_s27, 4  ;;  %s132_s28 = int_to_ptr.vmem [resolvable:$true] %s131_s28 }
  0x17   : > { %s148_s30 = sand.u32 1, %s1072_s14   ;;  %s948_s6 = scalar_lea.hbm %s1370_s1, 2048 }
  0x18   : > { %p1175_p2 = pnand %p875_p1, %p1373_p4  ;;  %p949_p7 = scmp.ne.s32.totalorder %s1370_s1, %s948_s6 }
  0x19   : > { %p955_p1 = scmp.lt.u32.totalorder %s948_s6, %s1370_s1 }
  0x1a   : > { %p950_p8 = pneg %p1175_p2 }
  0x1c   : > { %p951_p9 = pnand %p950_p8, %p949_p7 }
  0x1e   : > { %p952_p10 = pneg %p951_p9 }
  0x20   : > { %p957_p4 = pnand %p955_p1, %p952_p10 }
  0x22   : > { %960 = shalt.err (!%p957_p4)
}
  0x23   : > { %s961_s11 = scalar_lea.vmem %s132_s28, 2048  ;;  %p969_p11 = scmp.lt.s32.totalorder %s132_s28, %s132_s28 }
  0x24   : > { %p962_p0 = scmp.ne.s32.totalorder %s132_s28, %s961_s11  ;;  %p970_p6 = scmp.lt.s32.totalorder %s961_s11, %s961_s11 }
  0x26   : > { %p964_p3 = pnand %p962_p0, %p950_p8  ;;  %p971_p13 = por %p970_p6, %p969_p11 }
  0x28   : > { %p965_p12 = pneg %p964_p3 }
  0x2a   : > { %p972_p5 = pnand %p971_p13, %p965_p12 }
  0x2c   : > { %975 = shalt.err (!%p972_p5)
}
  0x2d   : > { %s1079_s17 = smov 128   ;;  %s1080_s19 = smov 8  }
  0x2e   : > { %878 = dma.hbm_to_vmem [thread:$0]  (!%p1175_p2), %s1370_s1, 2048, %s132_s28, [#allocation6], %s1079_s17, %s1079_s17, %s1080_s19  }
  0x2f   : > { %p1383_p4 = scmp.ne.s32.totalorder %s1377_s22, 0  ;;  %p1384_p0 = scmp.lt.s32.totalorder %s1076_s15, 2 }
  0x30   : > { %s762_s5 = sshll.u32 %s148_s30, 5  ;;  %s763_s6 = sshll.u32 %s1076_s15, 7 }
  0x31   : > { %p1205_p3 = pnand %p1384_p0, %p1383_p4  ;;  %s1213_s29 = scalar_lea.hbm %s1369_s0, %s763_s6 }
  0x32   : > { %s152_s28 = scalar_lea.vmem [#allocation2], %s762_s5  ;;  %s1217_s9 = scalar_lea.sflag [#allocation3], %s148_s30 }
  0x33   : > { %s158_s22 = sshll.u32 %s152_s28, 4  ;;  %s976_s10 = scalar_lea.hbm %s1213_s29, 512  ;;  %s1215_s22 = int_to_ptr.vmem [resolvable:$true] %s158_s22 }
  0x34   : > { %p977_p5 = scmp.ne.s32.totalorder %s1213_s29, %s976_s10  ;;  %p978_p6 = pneg %p1205_p3 }
  0x35   : > { %s981_s27 = scalar_lea.hbm %s1369_s0, 1024  ;;  %p982_p13 = scmp.lt.u32.totalorder %s1213_s29, %s1369_s0 }
  0x36   : > { %p979_p11 = pnand %p978_p6, %p977_p5  ;;  %p983_p2 = scmp.lt.u32.totalorder %s981_s27, %s976_s10 }
  0x37   : > { %p985_p8 = scmp.lt.u32.totalorder %s976_s10, %s1213_s29 }
  0x38   : > { %p980_p12 = pneg %p979_p11  ;;  %p984_p7 = por %p983_p2, %p982_p13 }
  0x3a   : > { %p986_p9 = por %p985_p8, %p984_p7 }
  0x3c   : > { %p987_p10 = pnand %p986_p9, %p980_p12 }
  0x3e   : > { %990 = shalt.err (!%p987_p10)
}
  0x3f   : > { %s991_s30 = scalar_lea.vmem %s1215_s22, 512  ;;  %s1081_s5 = smov [#allocation2]  }
  0x40   : > { %p992_p1 = scmp.ne.s32.totalorder %s1215_s22, %s991_s30  ;;  %s996_s8 = sshll.u32 %s1081_s5, 4  ;;  %s997_s8 = int_to_ptr.vmem [resolvable:$false] %s996_s8 }
  0x41   : > { %s998_s28 = scalar_lea.vmem %s997_s8, 1024  ;;  %p999_p5 = scmp.lt.s32.totalorder %s1215_s22, %s997_s8 }
  0x42   : > { %p994_p4 = pnand %p992_p1, %p978_p6  ;;  %p1000_p11 = scmp.lt.s32.totalorder %s998_s28, %s991_s30 }
  0x44   : > { %p995_p0 = pneg %p994_p4  ;;  %p1001_p13 = por %p1000_p11, %p999_p5 }
  0x46   : > { %p1002_p2 = pnand %p1001_p13, %p995_p0 }
  0x48   : > { %1005 = shalt.err (!%p1002_p2)
}
  0x49   : > { %s1082_s10 = smov 256   ;;  %p1386_p6 = scmp.ne.s32.totalorder %s1381_s26, 0 }
  0x4a   : > { %882 = dma.hbm_to_vmem [thread:$0]  (!%p1205_p3), %s1213_s29, 512, %s1215_s22, %s1217_s9, %s1082_s10, %s1079_s17, %s1080_s19  }
  0x4b   : > { %170 = sbr.rel (%p1386_p6) target bundleno = 547 (0x223), region = 32  ;;  %s1250_s11 = sand.u32 (!%p1386_p6), 1, %s1068_s13  }
  0x4c   : > { %s765_s20 = sshll.u32 (!%p1386_p6), %s1250_s11, 5  ;;  %s173_s27 = scalar_lea.sflag (!%p1386_p6), [#allocation3], %s1250_s11 }
  0x4d   : > { %s1254_s6 = scalar_lea.vmem (!%p1386_p6), [#allocation2], %s765_s20  ;;  %p1387_p12 = scmp.ne.s32.totalorder (!%p1386_p6), %s1378_s23, 0 }
  0x52   : > { %1051 = dma.done.wait (%p1387_p12), %s173_s27, 512  }
  0x53   : > { %1053 = vsyncadd (%p1387_p12), %s173_s27, 4294966784  ;;  %p1388_p3 = scmp.eq.s32.totalorder %s1128_s16, 0 }
  0x55   : > { %1055 = dma.done.wait (%p1388_p3), [#allocation6], 2048   ;;  %p1389_p7 = pmov %p1388_p3 }
  0x56   : > { %v1083_v0 = vmov 0.0|0.0   ;;  %vm1084_vm0 = vmmov 0   ;;  %v1085_v1 = vmov 0.0   ;;  %v215_v2 = vld [vmem:[#allocation5] sm:$0xff]  ;;  %v216_v3 = vld [vmem:[#allocation5 + $0x8] sm:$0xff]  ;;  %v217_v4 = vld [vmem:[#allocation5 + $0x10] sm:$0xff] }
  0x57   : > { %1057 = vsyncadd (%p1389_p7), [#allocation6], 4294965248  ;;  %843 = vmatprep.subr.bf16.mxu0 %v1083_v0  ;;  %849 = vmatprep.subr.bf16.mxu1 %v1083_v0  ;;  %vm205_vm1 = vcmask 261120   ;;  %v844_v5 = vpack.c.bf16 %v216_v3, %v215_v2  ;;  %v218_v6 = vld [vmem:[#allocation5 + $0x18] sm:$0xff]  ;;  %v322_v7 = vld [vmem:[#allocation5 + $0x20] sm:$0xff]  ;;  %vm293_vm2 = vcmask 253952  }
  0x58   : > { %807 = vmatprep.mubr.msk.f32.mxu0 %vm1084_vm0, %v1085_v1  ;;  %818 = vmatprep.mubr.msk.f32.mxu1 %vm1084_vm0, %v1085_v1  ;;  %v323_v8 = vld [vmem:[#allocation5 + $0x28] sm:$0xff]  ;;  %v1271_v10 = vld [vmem:[%s1254_s6] sm:$0xff]  ;;  %v324_v11 = vld [vmem:[#allocation5 + $0x30] sm:$0xff]  ;;  %v847_v13 = vpack.c.bf16 %v218_v6, %v217_v4  ;;  %vm400_vm3 = vcmask 254977   ;;  %vm507_vm4 = vcmask 256002   ;;  %vm614_vm5 = vcmask 257027  }
  0x59   : > { %v850_v9 = vpack.c.bf16 %v323_v8, %v322_v7  ;;  %v325_v12 = vld [vmem:[#allocation5 + $0x38] sm:$0xff]  ;;  %845 = vmatpush3.bf16.msra.mxu0 %v844_v5  ;;  %v206_v14 = vsel %vm205_vm1, %v1271_v10, 0.0  ;;  %v1276_v15 = vld [vmem:[%s1254_s6 + $0x8] sm:$0xff]  ;;  %v1283_v20 = vld [vmem:[%s1254_s6 + $0x10] sm:$0xff]  ;;  %v297_v7 = vlaneseq  ;;  %s767_s17 = sshll.u32 %s1250_s11, 3  ;;  %s776_s19 = sshll.u32 %s1128_s16, 7 }
  0x5a   : > { %846 = vmatprep.subr.bf16.mxu0 %v1083_v0  ;;  %v207_v16 = vrot.slane %v206_v14, 4  ;;  %v853_v17 = vpack.c.bf16 %v325_v12, %v324_v11  ;;  %v313_v18 = vsel %vm205_vm1, %v1276_v15, 0.0  ;;  %v420_v22 = vsel %vm205_vm1, %v1283_v20, 0.0  ;;  %v1288_v23 = vld [vmem:[%s1254_s6 + $0x18] sm:$0xff]  ;;  %v429_v36 = vld [vmem:[#allocation5 + $0x40] sm:$0xff]  ;;  %v430_v37 = vld [vmem:[#allocation5 + $0x48] sm:$0xff]  ;;  %s1324_s7 = scalar_lea.hbm %s1372_s3, %s776_s19 }
  0x5b   : > { %851 = vmatpush3.bf16.msra.mxu1 %v850_v9  ;;  %v314_v19 = vrot.slane %v313_v18, 4  ;;  %v421_v25 = vrot.slane %v420_v22, 4  ;;  %v527_v26 = vsel %vm205_vm1, %v1288_v23, 0.0  ;;  %v536_v40 = vld [vmem:[#allocation5 + $0x60] sm:$0xff]  ;;  %v537_v41 = vld [vmem:[#allocation5 + $0x68] sm:$0xff]  ;;  %v856_v45 = vpack.c.bf16 %v430_v37, %v429_v36  ;;  %v431_v49 = vld [vmem:[#allocation5 + $0x50] sm:$0xff] }
  0x5c   : > { %852 = vmatprep.subr.bf16.mxu1 %v1083_v0  ;;  %v208_v21 = vadd.f32 %v207_v16, %v206_v14  ;;  %v528_v28 = vrot.slane %v527_v26, 4  ;;  %v432_v50 = vld [vmem:[#allocation5 + $0x58] sm:$0xff]  ;;  %v862_v51 = vpack.c.bf16 %v537_v41, %v536_v40  ;;  %v538_v54 = vld [vmem:[#allocation5 + $0x70] sm:$0xff]  ;;  %v203_v62 = vld [vmem:[%s1371_s2] sm:$0xf]  ;;  %v298_v8 = vshrl.u32 %v297_v7, 7 }
  0x5d   : > { %848 = vmatpush3.bf16.msra.mxu0 %v847_v13  ;;  %v315_v24 = vadd.f32 %v314_v19, %v313_v18  ;;  %v422_v30 = vadd.f32 %v421_v25, %v420_v22  ;;  %v539_v55 = vld [vmem:[#allocation5 + $0x78] sm:$0xff]  ;;  %v859_v57 = vpack.c.bf16 %v432_v50, %v431_v49  ;;  %s202_s4 = scalar_lea.vmem [#allocation7], %s767_s17  ;;  %s665_s30 = scalar_lea.sflag [#allocation4], %s1250_s11 }
  0x5e   : > { %855 = vmatprep.subr.bf16.mxu0 %v1083_v0  ;;  %v209_v27 = vrot.slane %v208_v21, 2  ;;  %v529_v32 = vadd.f32 %v528_v28, %v527_v26  ;;  %v865_v59 = vpack.c.bf16 %v539_v55, %v538_v54  ;;  %v299_v9 = vsub.s32 0, %v298_v8  ;;  %s678_s29 = sshll.u32 %s202_s4, 4  ;;  %p1390_p9 = scmp.ne.s32.totalorder %s1379_s24, 0  ;;  %s1326_s29 = int_to_ptr.vmem [resolvable:$true] %s678_s29 }
  0x5f   : > { %854 = vmatpush3.bf16.msra.mxu1 %v853_v17  ;;  %v316_v29 = vrot.slane %v315_v24, 2  ;;  %v423_v34 = vrot.slane %v422_v30, 2  ;;  %v414_v36 = vsub.s32 1, %v298_v8  ;;  %v521_v40 = vsub.s32 2, %v298_v8  ;;  %s1006_s16 = scalar_lea.vmem %s1326_s29, 128  ;;  %s1086_s5 = smov [#allocation7]  }
  0x60   : > { %861 = vmatprep.subr.bf16.mxu1 %v1083_v0  ;;  %v210_v31 = vadd.f32 %v209_v27, %v208_v21  ;;  %v530_v38 = vrot.slane %v529_v32, 2  ;;  %p1007_p8 = scmp.ne.s32.totalorder %s1326_s29, %s1006_s16  ;;  %s1010_s8 = sshll.u32 %s1086_s5, 4  ;;  %s1011_s8 = int_to_ptr.vmem [resolvable:$false] %s1010_s8 }
  0x61   : > { %v317_v33 = vadd.f32 %v316_v29, %v315_v24  ;;  %v424_v42 = vadd.f32 %v423_v34, %v422_v30  ;;  %s1012_s28 = scalar_lea.vmem %s1011_s8, 256  ;;  %p1013_p4 = scmp.lt.s32.totalorder %s1326_s29, %s1011_s8 }
  0x62   : > { %v211_v35 = vrot.slane %v210_v31, 1  ;;  %v531_v44 = vadd.f32 %v530_v38, %v529_v32  ;;  %p1008_p10 = pnand %p1007_p8, %p1390_p9  ;;  %p1014_p0 = scmp.lt.s32.totalorder %s1012_s28, %s1006_s16 }
  0x63   : > { %v318_v39 = vrot.slane %v317_v33, 1  ;;  %v425_v47 = vrot.slane %v424_v42, 1 }
  0x64   : > { %v212_v43 = vadd.f32 %v211_v35, %v210_v31  ;;  %v532_v52 = vrot.slane %v531_v44, 1  ;;  %p1009_p1 = pneg %p1008_p10  ;;  %p1015_p5 = por %p1014_p0, %p1013_p4 }
  0x65   : > { %v319_v46 = vadd.f32 %v318_v39, %v317_v33  ;;  %v426_v56 = vadd.f32 %v425_v47, %v424_v42 }
  0x66   : > { %v214_v48 = vmul.f32 0.125, %v212_v43  ;;  %v533_v58 = vadd.f32 %v532_v52, %v531_v44  ;;  %p1016_p11 = pnand %p1015_p5, %p1009_p1 }
  0x67   : > { %v320_v53 = vmul.f32 0.125, %v319_v46  ;;  %v427_v60 = vmul.f32 0.125, %v426_v56 }
  0x68   : > { %808 = vmatmul.mubr.msk.f32.vlgmr.msra.gmra.mrb[0].mxu0 %vm205_vm1, %v214_v48  ;;  %v534_v61 = vmul.f32 0.125, %v533_v58  ;;  %v292_v63 = vmul.f32 %v214_v48, %v203_v62 }
  0x69   : > { %857 = vmatpush3.bf16.msra.mxu0 %v856_v45  ;;  %819 = vmatmul.mubr.msk.f32.vlgmr.msra.gmra.mrb[0].mxu1 %vm205_vm1, %v320_v53  ;;  %v628_v45 = vsub.s32 3, %v298_v8 }
  0x6a   : > { %858 = vmatprep.subr.bf16.mxu0 %v1083_v0  ;;  %863 = vmatpush3.bf16.msra.mxu1 %v862_v51  ;;  %v294_v2 = vsel %vm293_vm2, %v292_v63, 0.0  ;;  %v613_v5 = vmul.f32 %v534_v61, %v203_v62 }
  0x6b   : > { %829 = vmatprep.mubr.msk.f32.mxu0 %vm1084_vm0, %v1085_v1  ;;  %864 = vmatprep.subr.bf16.mxu1 %v1083_v0  ;;  %v399_v0 = vmul.f32 %v320_v53, %v203_v62 }
  0x6c   : > { %840 = vmatprep.mubr.msk.f32.mxu1 %vm1084_vm0, %v1085_v1  ;;  %295 = vadd.xlane.f32.xlu0 %v294_v2  ;;  %v506_v1 = vmul.f32 %v427_v60, %v203_v62  ;;  %v615_v6 = vsel %vm614_vm5, %v613_v5, 0.0 }
  0x6d   : > { %860 = vmatpush3.bf16.msra.mxu0 %v859_v57  ;;  %v401_v3 = vsel %vm400_vm3, %v399_v0, 0.0 }
  0x6e   : > { %866 = vmatpush3.bf16.msra.mxu1 %v865_v59  ;;  %v508_v4 = vsel %vm507_vm4, %v506_v1, 0.0 }
  0x70   : > { %830 = vmatmul.mubr.msk.f32.vlgmr.msra.gmra.mrb[2].mxu0 %vm205_vm1, %v427_v60  ;;  %402 = vadd.xlane.f32.xlu0 %v401_v3 }
  0x71   : > { %841 = vmatmul.mubr.msk.f32.vlgmr.msra.gmra.mrb[2].mxu1 %vm205_vm1, %v534_v61 }
  0x74   : > { %509 = vadd.xlane.f32.xlu0 %v508_v4 }
  0x78   : > { %616 = vadd.xlane.f32.xlu0 %v615_v6 }
  0xf9   : > { %v296_v34 = vpop.xlane.xlu0 %295 }
  0xfa   : > { %v308_v41 = vrot.slane %v296_v34, %v299_v9 }
  0xfd   : > { %v403_v35 = vpop.xlane.xlu0 %402 }
  0xfe   : > { %v415_v39 = vrot.slane %v403_v35, %v414_v36 }
 0x101   : > { %v510_v38 = vpop.xlane.xlu0 %509 }
 0x102   : > { %v522_v44 = vrot.slane %v510_v38, %v521_v40 }
 0x105   : > { %v617_v47 = vpop.xlane.xlu0 %616 }
 0x106   : > { %v629_v50 = vrot.slane %v617_v47, %v628_v45 }
 0x13b   : > { %v288_v11 = vpop.f32.mrb[0].mxu0 }
 0x13c   : > { %v300_v12 = vrot.slane %v288_v11, %v299_v9  ;;  %v809_v13 = vpop.f32.mrb[1].mxu0  ;;  %v395_v14 = vpop.f32.mrb[0].mxu1 }
 0x13d   : > { %v407_v16 = vrot.slane %v395_v14, %v299_v9  ;;  %v820_v17 = vpop.f32.mrb[1].mxu1 }
 0x13e   : > { %v301_v18 = vmul.f32 %v300_v12, %v1271_v10 }
 0x13f   : > { %v408_v19 = vmul.f32 %v1276_v15, %v407_v16 }
 0x140   : > { %v302_v21 = vsel %vm205_vm1, %v301_v18, 0.0 }
 0x141   : > { %303 = vadd.xlane.f32.xlu1 %v302_v21  ;;  %v409_v22 = vsel %vm205_vm1, %v408_v19, 0.0 }
 0x143   : > { %v502_v24 = vpop.f32.mrb[2].mxu0 }
 0x144   : > { %v514_v25 = vrot.slane %v502_v24, %v299_v9  ;;  %v831_v26 = vpop.f32.mrb[3].mxu0  ;;  %v609_v27 = vpop.f32.mrb[2].mxu1 }
 0x145   : > { %410 = vadd.xlane.f32.xlu1 %v409_v22  ;;  %v621_v28 = vrot.slane %v609_v27, %v299_v9  ;;  %v842_v29 = vpop.f32.mrb[3].mxu1 }
 0x146   : > { %v515_v30 = vmul.f32 %v1283_v20, %v514_v25 }
 0x147   : > { %v622_v31 = vmul.f32 %v1288_v23, %v621_v28 }
 0x148   : > { %v516_v32 = vsel %vm205_vm1, %v515_v30, 0.0 }
 0x149   : > { %517 = vadd.xlane.f32.xlu1 %v516_v32  ;;  %v623_v33 = vsel %vm205_vm1, %v622_v31, 0.0 }
 0x14d   : > { %624 = vadd.xlane.f32.xlu1 %v623_v33 }
 0x1ce   : > { %v304_v37 = vpop.xlane.xlu1 %303 }
 0x1cf   : > { %v309_v46 = vadd.f32 %v308_v41, %v304_v37 }
 0x1d2   : > { %v411_v42 = vpop.xlane.xlu1 %410 }
 0x1d3   : > { %v416_v43 = vadd.f32 %v415_v39, %v411_v42 }
 0x1d5   : > { %930 = vtanh.f32 %v416_v43 }
 0x1d6   : > { %v518_v48 = vpop.xlane.xlu1 %517  ;;  %932 = vtanh.f32 %v309_v46 }
 0x1d7   : > { %v523_v49 = vadd.f32 %v522_v44, %v518_v48 }
 0x1d9   : > { %934 = vtanh.f32 %v523_v49 }
 0x1da   : > { %v625_v51 = vpop.xlane.xlu1 %624 }
 0x1db   : > { %v630_v52 = vadd.f32 %v629_v50, %v625_v51 }
 0x1dd   : > { %936 = vtanh.f32 %v630_v52 }
 0x1df   : > { %v931_v53 = vpop.eup %930 }
 0x1e0   : > { %v933_v54 = vpop.eup %932 }
 0x1e1   : > { %v632_v56 = vmax.f32 %v933_v54, %v931_v53 }
 0x1e3   : > { %v935_v55 = vpop.eup %934 }
 0x1e4   : > { %v633_v57 = vmax.f32 %v632_v56, %v935_v55 }
 0x1e7   : > { %v937_v58 = vpop.eup %936 }
 0x1e8   : > { %v634_v59 = vmax.f32 %v633_v57, %v937_v58 }
 0x1ea   : > { %v635_v60 = vsub.f32 %v933_v54, %v634_v59  ;;  %v638_v61 = vsub.f32 %v931_v53, %v634_v59  ;;  %v641_v62 = vsub.f32 %v935_v55, %v634_v59  ;;  %v644_v63 = vsub.f32 %v937_v58, %v634_v59 }
 0x1ec   : > { %v636_v2 = vmul.f32 1.442695, %v635_v60  ;;  %v639_v0 = vmul.f32 1.442695, %v638_v61  ;;  %v642_v3 = vmul.f32 1.442695, %v641_v62 }
 0x1ed   : > { %v645_v1 = vmul.f32 1.442695, %v644_v63 }
 0x1ee   : > { %938 = vpow2.f32 %v636_v2 }
 0x1ef   : > { %940 = vpow2.f32 %v639_v0 }
 0x1f0   : > { %942 = vpow2.f32 %v642_v3 }
 0x1f1   : > { %944 = vpow2.f32 %v645_v1 }
 0x1f8   : > { %v939_v4 = vpop.eup %938 }
 0x1f9   : > { %v941_v5 = vpop.eup %940 }
 0x1fa   : > { %v647_v6 = vadd.f32 %v941_v5, %v939_v4  ;;  %v943_v7 = vpop.eup %942 }
 0x1fb   : > { %v945_v9 = vpop.eup %944 }
 0x1fc   : > { %v648_v8 = vadd.f32 %v943_v7, %v647_v6 }
 0x1fe   : > { %v649_v11 = vadd.f32 %v945_v9, %v648_v8 }
 0x200   : > { %946 = vrcp.f32 %v649_v11 }
 0x20a   : > { %v947_v12 = vpop.eup %946 }
 0x20b   : > { %v652_v13 = vmul.f32 %v947_v12, %v939_v4  ;;  %v654_v14 = vmul.f32 %v947_v12, %v941_v5  ;;  %v657_v16 = vmul.f32 %v947_v12, %v943_v7  ;;  %v660_v19 = vmul.f32 %v947_v12, %v945_v9 }
 0x20d   : > { %v653_v17 = vmul.f32 %v652_v13, %v1271_v10  ;;  %v655_v18 = vmul.f32 %v1276_v15, %v654_v14  ;;  %v658_v22 = vmul.f32 %v1283_v20, %v657_v16  ;;  %v661_v25 = vmul.f32 %v1288_v23, %v660_v19 }
 0x20f   : > { %v656_v21 = vadd.f32 %v655_v18, %v653_v17 }
 0x211   : > { %v659_v24 = vadd.f32 %v658_v22, %v656_v21 }
 0x213   : > { %v662_v26 = vadd.f32 %v661_v25, %v659_v24 }
 0x215   : > { %663 = vst.msk [vmem:[%s202_s4] sm:$0xff] %vm205_vm1, %v662_v26 }
 0x216   : > { %1019 = shalt.err (!%p1016_p11)
}
 0x217   : > { %s1020_s10 = scalar_lea.hbm %s1324_s7, 128  ;;  %s1024_s27 = scalar_lea.hbm %s1372_s3, 256 }
 0x218   : > { %p1021_p13 = scmp.ne.s32.totalorder %s1324_s7, %s1020_s10  ;;  %p1025_p12 = scmp.lt.u32.totalorder %s1324_s7, %s1372_s3 }
 0x219   : > { %p1026_p3 = scmp.lt.u32.totalorder %s1024_s27, %s1020_s10  ;;  %p1028_p8 = scmp.lt.u32.totalorder %s1020_s10, %s1324_s7 }
 0x21a   : > { %p1022_p2 = pnand %p1021_p13, %p1390_p9 }
 0x21b   : > { %p1027_p7 = por %p1026_p3, %p1025_p12 }
 0x21c   : > { %p1023_p6 = pneg %p1022_p2 }
 0x21d   : > { %p1029_p10 = por %p1028_p8, %p1027_p7 }
 0x21f   : > { %p1030_p1 = pnand %p1029_p10, %p1023_p6 }
 0x221   : > { %1033 = shalt.err (!%p1030_p1)
}
 0x222   : > { %873 = dma.vmem_to_hbm [thread:$0]  (%p1390_p9), %s1326_s29, 128, %s1324_s7, %s665_s30  }
 0x223 PF: > { %s690_s26 = sand.u32 1, %s1064_s12   ;;  %p1391_p4 = scmp.ne.s32.totalorder %s1380_s25, 0 }
 0x224   : > { %p1392_p0 = scmp.ge.s32.totalorder %s1076_s15, 2  ;;  %s691_s17 = scalar_lea.sflag [#allocation4], %s690_s26 }
 0x226   : > { %p884_p5 = pnand %p1392_p0, %p1391_p4 }
 0x228   : > { %1059 = dma.done.wait (!%p884_p5), %s691_s17, 128  }
 0x229   : > { %1061 = vsyncadd (!%p884_p5), %s691_s17, 4294967168  ;;  %p17_p11 = scmp.ge.s32.totalorder %s1132_s18, 4   ;;  %s1393_s12 = smov %s1068_s13 }
 0x22a   : > { %s1394_s13 = smov %s1072_s14  ;;  %s1395_s14 = smov %s1144_s21 }
 0x22b   : > { %s1396_s15 = smov %s1132_s18  ;;  %19 = sbr.rel (!%p17_p11) target bundleno = 6 (0x6), region = 87 }
 0x232   :  { %696 = vsyncpa [#allocation3], 1 }
 0x233   :  { %698 = vsyncpa [#allocation3 + $0x1], 1 }
 0x234   :  { %699 = vsyncpa [#allocation6], 1 }
 0x235   :  { %700 = vsyncpa [#allocation4], 1 }
 0x236   :  { %702 = vsyncpa [#allocation4 + $0x1], 1 }

</bundles_post_ra>
